<compile_context>
chip_gen: v5e
topology: v5e:2x2
jax: 0.10.0
libtpu: 0.0.40
codegen_flags: <defaults>
</compile_context>

<pallas_src>
import functools

import jax
import jax.numpy as jnp
from jax.experimental import pallas as pl
from jax.experimental.pallas import tpu as pltpu


def _stats_kernel(za_ref, zb_ref, mean_a_ref, scale_a_ref, mean_b_ref,
                  scale_b_ref, corr_ref, corr_acc, *, lambda_param):
    """Per-feature mean / fused inv-std scale + diagonal loss correction."""
    j = pl.program_id(0)

    za = za_ref[...].astype(jnp.float32)          # (N, td)
    zb = zb_ref[...].astype(jnp.float32)          # (N, td)
    n = za.shape[0]

    inv_n = 1.0 / n
    inv_nm1 = 1.0 / (n - 1)                       # torch.std default (ddof=1)
    inv_sqrt_n = 1.0 / (n ** 0.5)                 # folds the 1/N of C into scales

    mean_a = jnp.sum(za, axis=0, keepdims=True) * inv_n      # (1, td)
    mean_b = jnp.sum(zb, axis=0, keepdims=True) * inv_n
    za_c = za - mean_a
    zb_c = zb - mean_b
    var_a = jnp.sum(za_c * za_c, axis=0, keepdims=True) * inv_nm1
    var_b = jnp.sum(zb_c * zb_c, axis=0, keepdims=True) * inv_nm1

    # NOTE: zero-variance features give inf/nan here, same as the PyTorch ref.
    scale_a = jax.lax.rsqrt(var_a) * inv_sqrt_n   # rsqrt -> EUP slot
    scale_b = jax.lax.rsqrt(var_b) * inv_sqrt_n

    mean_a_ref[...] = mean_a
    scale_a_ref[...] = scale_a
    mean_b_ref[...] = mean_b
    scale_b_ref[...] = scale_b

    # diag(C) for this feature tile, straight from the (N, td) data.
    diag = jnp.sum(za_c * zb_c, axis=0, keepdims=True) * (scale_a * scale_b)
    # Correction so the main pass needs no diagonal masking:
    #   loss = lambda * sum(C^2) + sum_i [(C_ii - 1)^2 - lambda * C_ii^2]
    tile_corr = jnp.sum((diag - 1.0) ** 2 - lambda_param * diag * diag)

    @pl.when(j == 0)
    def _():
        corr_acc[0] = jnp.float32(0.0)

    corr_acc[0] += tile_corr

    @pl.when(j == pl.num_programs(0) - 1)
    def _():
        corr_ref[0, 0] = corr_acc[0]


def _cross_corr_kernel(za_ref, zb_ref, mean_a_ref, scale_a_ref, mean_b_ref,
                       scale_b_ref, out_ref, acc_ref, *, lambda_param,
                       bf16_matmul):
    """lambda * sum(C_tile^2) for one (td, td) tile of the cross-correlation."""
    k = pl.program_id(2)

    @pl.when(k == 0)
    def _():
        acc_ref[...] = jnp.zeros_like(acc_ref)

    # Normalize on the fly: (z - mean) * (rsqrt(var) / sqrt(N)).
    a = (za_ref[...].astype(jnp.float32) - mean_a_ref[...]) * scale_a_ref[...]
    b = (zb_ref[...].astype(jnp.float32) - mean_b_ref[...]) * scale_b_ref[...]
    if bf16_matmul:
        a = a.astype(jnp.bfloat16)
        b = b.astype(jnp.bfloat16)

    # Contract over the batch axis directly (no explicit transpose), f32 acc.
    acc_ref[...] += jax.lax.dot_general(
        a, b,
        dimension_numbers=(((0,), (0,)), ((), ())),
        preferred_element_type=jnp.float32,
    )

    @pl.when(k == pl.num_programs(2) - 1)
    def _():
        c = acc_ref[...]
        partial = lambda_param * jnp.sum(c * c)
        # One lane-aligned (8, 128) output block per (i, j) tile keeps the two
        # D-tile grid axes race-free under "parallel" (megacore) semantics.
        row = jax.lax.broadcasted_iota(jnp.int32, (8, 128), 0)
        col = jax.lax.broadcasted_iota(jnp.int32, (8, 128), 1)
        out_ref[...] = jnp.where((row == 0) & (col == 0), partial, 0.0)


def _pick_tile(dim, target, quantum):
    """Largest multiple of `quantum` <= target that divides `dim`; falls back
    to the full dimension (always a legal block shape)."""
    if dim <= target or dim % quantum != 0:
        return dim
    t = (min(target, dim) // quantum) * quantum
    while t >= quantum:
        if dim % t == 0:
            return t
        t -= quantum
    return dim


def barlow_twins_loss(z_a, z_b, lambda_param=0.005, *, block_d=512,
                      block_n=256, bf16_matmul=False):
    assert z_a.shape == z_b.shape and z_a.ndim == 2
    n, d = z_a.shape
    assert n >= 2, "unbiased std (ddof=1) requires at least 2 samples"

    td = _pick_tile(d, block_d, 128)   # feature tile (lane axis)
    tn = _pick_tile(n, block_n, 8)     # batch tile (sublane / contraction axis)
    gd = d // td
    gk = n // tn
    f32 = jnp.float32

    # ---- Pass 1: per-feature stats + diagonal correction -------------------
    mean_a, scale_a, mean_b, scale_b, corr = pl.pallas_call(
        functools.partial(_stats_kernel, lambda_param=lambda_param),
        grid=(gd,),
        in_specs=[
            pl.BlockSpec((n, td), lambda j: (0, j)),
            pl.BlockSpec((n, td), lambda j: (0, j)),
        ],
        out_specs=(
            pl.BlockSpec((1, td), lambda j: (0, j)),
            pl.BlockSpec((1, td), lambda j: (0, j)),
            pl.BlockSpec((1, td), lambda j: (0, j)),
            pl.BlockSpec((1, td), lambda j: (0, j)),
            pl.BlockSpec(memory_space=pltpu.MemorySpace.SMEM),
        ),
        out_shape=(
            jax.ShapeDtypeStruct((1, d), f32),
            jax.ShapeDtypeStruct((1, d), f32),
            jax.ShapeDtypeStruct((1, d), f32),
            jax.ShapeDtypeStruct((1, d), f32),
            jax.ShapeDtypeStruct((1, 1), f32),
        ),
        scratch_shapes=[pltpu.SMEM((1,), f32)],
        compiler_params=pltpu.CompilerParams(
            dimension_semantics=("arbitrary",)),
    )(z_a, z_b)

    # ---- Pass 2: tiled cross-correlation + weighted Frobenius sum ----------
    partials = pl.pallas_call(
        functools.partial(_cross_corr_kernel, lambda_param=lambda_param,
                          bf16_matmul=bf16_matmul),
        grid=(gd, gd, gk),
        in_specs=[
            pl.BlockSpec((tn, td), lambda i, j, k: (k, i)),   # z_a col-tile i
            pl.BlockSpec((tn, td), lambda i, j, k: (k, j)),   # z_b col-tile j
            pl.BlockSpec((1, td), lambda i, j, k: (0, i)),    # mean_a
            pl.BlockSpec((1, td), lambda i, j, k: (0, i)),    # scale_a
            pl.BlockSpec((1, td), lambda i, j, k: (0, j)),    # mean_b
            pl.BlockSpec((1, td), lambda i, j, k: (0, j)),    # scale_b
        ],
        out_specs=pl.BlockSpec((8, 128), lambda i, j, k: (i, j)),
        out_shape=jax.ShapeDtypeStruct((gd * 8, gd * 128), f32),
        scratch_shapes=[pltpu.VMEM((td, td), f32)],
        compiler_params=pltpu.CompilerParams(
            dimension_semantics=("parallel", "parallel", "arbitrary")),
    )(z_a, z_b, mean_a, scale_a, mean_b, scale_b)

    # Tiny finalize: sum of (D/td)^2 per-tile partials + diagonal correction.
    return jnp.sum(partials) + corr[0, 0]


def _reference_loss(z_a, z_b, lambda_param=0.005):
    z_a = z_a.astype(jnp.float32)
    z_b = z_b.astype(jnp.float32)
    n, d = z_a.shape
    za_n = (z_a - z_a.mean(0)) / z_a.std(0, ddof=1)
    zb_n = (z_b - z_b.mean(0)) / z_b.std(0, ddof=1)
    c = (za_n.T @ zb_n) / n
    eye = jnp.eye(d, dtype=bool)
    c_diff = (c - jnp.eye(d)) ** 2
    c_diff = jnp.where(eye, c_diff, c_diff * lambda_param)
    return jnp.sum(c_diff)


if __name__ == "__main__":
    key = jax.random.PRNGKey(0)
    ka, kb = jax.random.split(key)
    N, D = 32, 256  # small but big enough to exercise a (2, 2, 2) tiled grid
    z_a = jax.random.normal(ka, (N, D), dtype=jnp.float32)
    z_b = jax.random.normal(kb, (N, D), dtype=jnp.float32)

    loss = jax.block_until_ready(
        barlow_twins_loss(z_a, z_b, block_d=128, block_n=16))
    ref = jax.block_until_ready(_reference_loss(z_a, z_b))

    assert jnp.allclose(loss, ref, rtol=3e-5, atol=1e-5), (loss, ref)
    print("KERNEL_OK")
</pallas_src>

<mosaic_0001>
module attributes {stable_mosaic.version = 11 : i64} {
  func.func @_stats_kernel(%arg0: i32, %arg1: memref<32x128xf32, #tpu.memory_space<vmem>>, %arg2: memref<32x128xf32, #tpu.memory_space<vmem>>, %arg3: memref<1x128xf32, #tpu.memory_space<vmem>>, %arg4: memref<1x128xf32, #tpu.memory_space<vmem>>, %arg5: memref<1x128xf32, #tpu.memory_space<vmem>>, %arg6: memref<1x128xf32, #tpu.memory_space<vmem>>, %arg7: memref<1x1xf32, #tpu.memory_space<smem>>, %arg8: memref<1xf32, #tpu.memory_space<smem>>) attributes {dimension_semantics = [#tpu.dimension_semantics<arbitrary>], iteration_bounds = array<i64: 2>, scalar_prefetch = 0 : i64, scratch_operands = 1 : i64, tpu.core_type = #tpu.core_type<tc>, window_params = [{transform_indices = @transform_0, window_bounds = array<i64: 32, 128>}, {transform_indices = @transform_1, window_bounds = array<i64: 32, 128>}, {transform_indices = @transform_2, window_bounds = array<i64: 1, 128>}, {transform_indices = @transform_3, window_bounds = array<i64: 1, 128>}, {transform_indices = @transform_4, window_bounds = array<i64: 1, 128>}, {transform_indices = @transform_5, window_bounds = array<i64: 1, 128>}, {transform_indices = @transform_6, window_bounds = array<i64: 1, 1>}]} {
    %c0 = arith.constant 0 : index
    %c0_0 = arith.constant 0 : index
    %0 = vector.load %arg1[%c0, %c0_0] : memref<32x128xf32, #tpu.memory_space<vmem>>, vector<32x128xf32>
    %c0_1 = arith.constant 0 : index
    %c0_2 = arith.constant 0 : index
    %1 = vector.load %arg2[%c0_1, %c0_2] : memref<32x128xf32, #tpu.memory_space<vmem>>, vector<32x128xf32>
    %cst = arith.constant dense<0.000000e+00> : vector<128xf32>
    %2 = vector.multi_reduction <add>, %0, %cst [0] : vector<32x128xf32> to vector<128xf32>
    %3 = vector.shape_cast %2 : vector<128xf32> to vector<1x128xf32>
    %cst_3 = arith.constant 3.125000e-02 : f32
    %4 = vector.broadcast %cst_3 : f32 to vector<1x128xf32>
    %5 = arith.mulf %3, %4 : vector<1x128xf32>
    %cst_4 = arith.constant dense<0.000000e+00> : vector<128xf32>
    %6 = vector.multi_reduction <add>, %1, %cst_4 [0] : vector<32x128xf32> to vector<128xf32>
    %7 = vector.shape_cast %6 : vector<128xf32> to vector<1x128xf32>
    %cst_5 = arith.constant 3.125000e-02 : f32
    %8 = vector.broadcast %cst_5 : f32 to vector<1x128xf32>
    %9 = arith.mulf %7, %8 : vector<1x128xf32>
    %10 = vector.broadcast %5 : vector<1x128xf32> to vector<32x128xf32>
    %11 = arith.subf %0, %10 : vector<32x128xf32>
    %12 = vector.broadcast %9 : vector<1x128xf32> to vector<32x128xf32>
    %13 = arith.subf %1, %12 : vector<32x128xf32>
    %14 = arith.mulf %11, %11 : vector<32x128xf32>
    %cst_6 = arith.constant dense<0.000000e+00> : vector<128xf32>
    %15 = vector.multi_reduction <add>, %14, %cst_6 [0] : vector<32x128xf32> to vector<128xf32>
    %16 = vector.shape_cast %15 : vector<128xf32> to vector<1x128xf32>
    %cst_7 = arith.constant 0.0322580636 : f32
    %17 = vector.broadcast %cst_7 : f32 to vector<1x128xf32>
    %18 = arith.mulf %16, %17 : vector<1x128xf32>
    %19 = arith.mulf %13, %13 : vector<32x128xf32>
    %cst_8 = arith.constant dense<0.000000e+00> : vector<128xf32>
    %20 = vector.multi_reduction <add>, %19, %cst_8 [0] : vector<32x128xf32> to vector<128xf32>
    %21 = vector.shape_cast %20 : vector<128xf32> to vector<1x128xf32>
    %cst_9 = arith.constant 0.0322580636 : f32
    %22 = vector.broadcast %cst_9 : f32 to vector<1x128xf32>
    %23 = arith.mulf %21, %22 : vector<1x128xf32>
    %24 = math.rsqrt %18 : vector<1x128xf32>
    %cst_10 = arith.constant 0.176776692 : f32
    %25 = vector.broadcast %cst_10 : f32 to vector<1x128xf32>
    %26 = arith.mulf %24, %25 : vector<1x128xf32>
    %27 = math.rsqrt %23 : vector<1x128xf32>
    %cst_11 = arith.constant 0.176776692 : f32
    %28 = vector.broadcast %cst_11 : f32 to vector<1x128xf32>
    %29 = arith.mulf %27, %28 : vector<1x128xf32>
    %c0_12 = arith.constant 0 : index
    %c0_13 = arith.constant 0 : index
    %30 = vector.load %arg3[%c0_12, %c0_13] : memref<1x128xf32, #tpu.memory_space<vmem>>, vector<1x128xf32>
    tpu.vector_store %arg3[%c0_12, %c0_13], %5 {strides = array<i32>} : memref<1x128xf32, #tpu.memory_space<vmem>>, vector<1x128xf32>,
    %c0_14 = arith.constant 0 : index
    %c0_15 = arith.constant 0 : index
    %31 = vector.load %arg4[%c0_14, %c0_15] : memref<1x128xf32, #tpu.memory_space<vmem>>, vector<1x128xf32>
    tpu.vector_store %arg4[%c0_14, %c0_15], %26 {strides = array<i32>} : memref<1x128xf32, #tpu.memory_space<vmem>>, vector<1x128xf32>,
    %c0_16 = arith.constant 0 : index
    %c0_17 = arith.constant 0 : index
    %32 = vector.load %arg5[%c0_16, %c0_17] : memref<1x128xf32, #tpu.memory_space<vmem>>, vector<1x128xf32>
    tpu.vector_store %arg5[%c0_16, %c0_17], %9 {strides = array<i32>} : memref<1x128xf32, #tpu.memory_space<vmem>>, vector<1x128xf32>,
    %c0_18 = arith.constant 0 : index
    %c0_19 = arith.constant 0 : index
    %33 = vector.load %arg6[%c0_18, %c0_19] : memref<1x128xf32, #tpu.memory_space<vmem>>, vector<1x128xf32>
    tpu.vector_store %arg6[%c0_18, %c0_19], %29 {strides = array<i32>} : memref<1x128xf32, #tpu.memory_space<vmem>>, vector<1x128xf32>,
    %34 = arith.mulf %11, %13 : vector<32x128xf32>
    %cst_20 = arith.constant dense<0.000000e+00> : vector<128xf32>
    %35 = vector.multi_reduction <add>, %34, %cst_20 [0] : vector<32x128xf32> to vector<128xf32>
    %36 = vector.shape_cast %35 : vector<128xf32> to vector<1x128xf32>
    %37 = arith.mulf %26, %29 : vector<1x128xf32>
    %38 = arith.mulf %36, %37 : vector<1x128xf32>
    %cst_21 = arith.constant 1.000000e+00 : f32
    %39 = vector.broadcast %cst_21 : f32 to vector<1x128xf32>
    %40 = arith.subf %38, %39 : vector<1x128xf32>
    %41 = arith.mulf %40, %40 : vector<1x128xf32>
    %cst_22 = arith.constant 5.000000e-03 : f32
    %42 = vector.broadcast %cst_22 : f32 to vector<1x128xf32>
    %43 = arith.mulf %42, %38 : vector<1x128xf32>
    %44 = arith.mulf %43, %38 : vector<1x128xf32>
    %45 = arith.subf %41, %44 : vector<1x128xf32>
    %46 = vector.shape_cast %45 : vector<1x128xf32> to vector<1x1x128xf32>
    %cst_23 = arith.constant dense<0.000000e+00> : vector<1xf32>
    %47 = vector.multi_reduction <add>, %46, %cst_23 [1, 2] : vector<1x1x128xf32> to vector<1xf32>
    %48 = vector.shape_cast %47 : vector<1xf32> to vector<1x1x1xf32>
    %49 = vector.extract %48[0, 0, 0] : f32 from vector<1x1x1xf32>
    %c0_i32 = arith.constant 0 : i32
    %50 = arith.cmpi eq, %arg0, %c0_i32 : i32
    %51 = arith.extui %50 : i1 to i32
    %c0_i32_24 = arith.constant 0 : i32
    %52 = arith.cmpi ne, %51, %c0_i32_24 : i32
    scf.if %52 {
      %cst_28 = arith.constant 0.000000e+00 : f32
      %c0_29 = arith.constant 0 : index
      %59 = memref.load %arg8[%c0_29] : memref<1xf32, #tpu.memory_space<smem>>
      memref.store %cst_28, %arg8[%c0_29] : memref<1xf32, #tpu.memory_space<smem>>
    } else {
    }
    %c0_25 = arith.constant 0 : index
    %53 = memref.load %arg8[%c0_25] : memref<1xf32, #tpu.memory_space<smem>>
    %54 = arith.addf %53, %49 : f32
    %c0_26 = arith.constant 0 : index
    %55 = memref.load %arg8[%c0_26] : memref<1xf32, #tpu.memory_space<smem>>
    memref.store %54, %arg8[%c0_26] : memref<1xf32, #tpu.memory_space<smem>>
    %c1_i32 = arith.constant 1 : i32
    %56 = arith.cmpi eq, %arg0, %c1_i32 : i32
    %57 = arith.extui %56 : i1 to i32
    %c0_i32_27 = arith.constant 0 : i32
    %58 = arith.cmpi ne, %57, %c0_i32_27 : i32
    scf.if %58 {
      %c0_28 = arith.constant 0 : index
      %59 = memref.load %arg8[%c0_28] : memref<1xf32, #tpu.memory_space<smem>>
      %c0_29 = arith.constant 0 : index
      %c0_30 = arith.constant 0 : index
      %60 = memref.load %arg7[%c0_29, %c0_30] : memref<1x1xf32, #tpu.memory_space<smem>>
      memref.store %59, %arg7[%c0_29, %c0_30] : memref<1x1xf32, #tpu.memory_space<smem>>
    } else {
    }
    return
  }
  func.func @transform_0(%arg0: i32) -> (i32, i32) {
    %c0_i32 = arith.constant 0 : i32
    %c0_i32_0 = arith.constant 0 : i32
    return %c0_i32, %arg0 : i32, i32
  }
  func.func @transform_1(%arg0: i32) -> (i32, i32) {
    %c0_i32 = arith.constant 0 : i32
    %c0_i32_0 = arith.constant 0 : i32
    return %c0_i32, %arg0 : i32, i32
  }
  func.func @transform_2(%arg0: i32) -> (i32, i32) {
    %c0_i32 = arith.constant 0 : i32
    %c0_i32_0 = arith.constant 0 : i32
    return %c0_i32, %arg0 : i32, i32
  }
  func.func @transform_3(%arg0: i32) -> (i32, i32) {
    %c0_i32 = arith.constant 0 : i32
    %c0_i32_0 = arith.constant 0 : i32
    return %c0_i32, %arg0 : i32, i32
  }
  func.func @transform_4(%arg0: i32) -> (i32, i32) {
    %c0_i32 = arith.constant 0 : i32
    %c0_i32_0 = arith.constant 0 : i32
    return %c0_i32, %arg0 : i32, i32
  }
  func.func @transform_5(%arg0: i32) -> (i32, i32) {
    %c0_i32 = arith.constant 0 : i32
    %c0_i32_0 = arith.constant 0 : i32
    return %c0_i32, %arg0 : i32, i32
  }
  func.func @transform_6(%arg0: i32) -> (i32, i32) {
    %c0_i32 = arith.constant 0 : i32
    %c0_i32_0 = arith.constant 0 : i32
    %c0_i32_1 = arith.constant 0 : i32
    return %c0_i32, %c0_i32_0 : i32, i32
  }
}

</mosaic_0001>

<bundles_post_ra>
// kernel: tpu_custom_call.1
= control target key start
LH: loop header
LB: loop body
LE: loop exit
PB: predicated region body
PF: predicated region fallthrough
CT: control target
= control target key end

     0   :  { %s1378_s0 = inlined_call_operand.hbm [shape: f32[32,256], index: 0, kind: input, shape index: {}]   ;;  %s1379_s1 = inlined_call_operand.hbm [shape: f32[32,256], index: 1, kind: input, shape index: {}]   ;;  %s1380_s2 = inlined_call_operand.hbm [shape: f32[1,256], index: 2, kind: output, shape index: {0}]   ;;  %s1381_s3 = inlined_call_operand.hbm [shape: f32[1,256], index: 3, kind: output, shape index: {1}]   ;;  %s1382_s4 = inlined_call_operand.hbm [shape: f32[1,256], index: 4, kind: output, shape index: {2}]   ;;  %s1383_s5 = inlined_call_operand.hbm [shape: f32[1,256], index: 5, kind: output, shape index: {3}]   ;;  %s1384_s6 = inlined_call_operand.hbm [shape: f32[1,1], index: 6, kind: output, shape index: {4}]  }
   0x1   :  { %1393 = sst [smem:[#allocation26_spill]] %s1378_s0 }
   0x2   :  { %12 = vsyncpa [#allocation4], 0 }
   0x3   :  { %14 = vsyncpa [#allocation4 + $0x1], 0 }
   0x4   :  { %15 = vsyncpa [#allocation8], 0 }
   0x5   :  { %17 = vsyncpa [#allocation8 + $0x1], 0 }
   0x6   :  { %18 = vsyncpa [#allocation5], 0 }
   0x7   :  { %20 = vsyncpa [#allocation5 + $0x1], 0 }
   0x8   :  { %21 = vsyncpa [#allocation11], 0 }
   0x9   :  { %23 = vsyncpa [#allocation11 + $0x1], 0 }
   0xa   :  { %24 = vsyncpa [#allocation14], 0 }
   0xb   :  { %26 = vsyncpa [#allocation14 + $0x1], 0 }
   0xc   :  { %27 = vsyncpa [#allocation6], 0  ;;  %s1119_s21 = smov 0   ;;  %s1121_s22 = smov 0  }
   0xd   :  { %s1123_s23 = smov 0   ;;  %s1125_s24 = smov 0  }
   0xe LB: > { %1394 = sst [smem:[#allocation22_spill]] %s1073_s23  ;;  %s1140_s25 = sadd.s32 4294967295, %s1077_s24   ;;  %s1077_s24 = sphi %s1125_s24, %s1414_s24   ;;  %s1073_s23 = sphi %s1123_s23, %s1416_s23   ;;  %s1069_s22 = sphi %s1121_s22, %s1418_s22   ;;  %s1065_s21 = sphi %s1119_s21, %s1417_s21  }
   0xf   : > { %s1385_s26 = sadd.s32 4294967294, %s1077_s24   ;;  %s1144_s27 = sadd.s32 1, %s1077_s24  }
  0x10   : > { %1395 = sst [smem:[#allocation23_spill]] %s1144_s27  ;;  %s40_s28 = sadd.s32 1, %s1073_s23 }
  0x11   : > { %s37_s29 = ssub.s32 %s1077_s24, %s1144_s27  ;;  %p47_p0 = scmp.ne.s32.totalorder %s1073_s23, %s1069_s22 }
  0x12   : > { %p38_p1 = scmp.eq.s32.totalorder %s37_s29, 0  ;;  %p48_p2 = scmp.eq.s32.totalorder %s1077_s24, 0 }
  0x13   : > { %p53_p3 = scmp.ne.s32.totalorder %s1069_s22, %s1065_s21  ;;  %p54_p4 = scmp.eq.s32.totalorder %s1140_s25, 0 }
  0x14   : > { %s1156_s30 = scalar_select %p38_p1, %s1073_s23, %s40_s28  }
  0x15   : > { %p1158_p5 = por %p48_p2, %p47_p0  ;;  %p1164_p6 = por %p54_p4, %p53_p3 }
  0x16   : > { %1396 = sst [smem:[#allocation24_spill]] %s1156_s30  ;;  %p1386_p7 = scmp.eq.s32.totalorder %s1140_s25, 1 }
  0x17   : > { %p109_p8 = scmp.eq.s32.totalorder %s1385_s26, 1  ;;  %p790_p10 = scmp.lt.s32.totalorder %s1077_s24, 2 }
  0x18   : > { %p1175_p11 = por %p1386_p7, %p47_p0  ;;  %s1184_s11 = sand.u32 1, %s1073_s23  }
  0x19   : > { %p1179_p12 = por %p109_p8, %p53_p3  ;;  %s1388_s12 = sshll.u32 %s1077_s24, 3 }
  0x1a   : > { %s1387_s13 = sshll.u32 %s1184_s11, 5  ;;  %s1402_s0 = sld [smem:[#allocation26_spill]] }
  0x1b   : > { %s1400_s10 = scalar_select %p1179_p12, 1, 0 }
  0x1c   : > { %s232_s18 = scalar_lea.vmem [#allocation3], %s1387_s13  ;;  %p1197_p13 = pnand %p790_p10, %p1158_p5 }
  0x1d   : > { %1401 = sst [smem:[#allocation25_spill]] %s1400_s10  ;;  %s239_s19 = sshll.u32 %s232_s18, 4  ;;  %s240_s19 = int_to_ptr.vmem [resolvable:$true] %s239_s19 }
  0x1e   : > { %p738_p0 = scmp.ge.s32.totalorder %s1077_s24, 1  ;;  %s229_s28 = scalar_lea.sflag [#allocation4], %s1184_s11 }
  0x1f   : > { %p841_p2 = pneg %p1197_p13 }
  0x20   : > { %s236_s16 = scalar_lea.hbm %s1402_s0, %s1388_s12  ;;  %s844_s15 = scalar_lea.hbm %s1402_s0, 64 }
  0x21   : > { %s237_s17 = sshll.u32 %s236_s16, 4  ;;  %s238_s17 = int_to_ptr.hbm [resolvable:$true] %s237_s17 }
  0x22   : > { %s837_s29 = sshra.s32 %s238_s17, 4  ;;  %s838_s29 = int_to_ptr.hbm [resolvable:$true] %s837_s29 }
  0x23   : > { %s839_s26 = scalar_lea.hbm %s838_s29, 32  ;;  %p845_p5 = scmp.lt.s32.totalorder %s838_s29, %s1402_s0 }
  0x24   : > { %p840_p1 = scmp.ne.s32.totalorder %s838_s29, %s839_s26  ;;  %p846_p10 = scmp.lt.s32.totalorder %s844_s15, %s839_s26 }
  0x26   : > { %p842_p3 = pnand %p841_p2, %p840_p1  ;;  %p847_p9 = por %p846_p10, %p845_p5 }
  0x28   : > { %p843_p8 = pneg %p842_p3 }
  0x2a   : > { %p848_p7 = pnand %p847_p9, %p843_p8 }
  0x2c   : > { %851 = shalt.err (!%p848_p7)
}
  0x2d   : > { %s1079_s13 = smov 256   ;;  %s1080_s12 = smov 128  }
  0x2e   : > { %s1081_s30 = smov 8   ;;  %p268_p1 = scmp.lt.s32.totalorder %s1077_s24, 3 }
  0x2f   : > { %773 = dma.hbm_to_vmem [thread:$0]  (!%p1197_p13), %s238_s17, 512, %s240_s19, %s229_s28, %s1079_s13, %s1080_s12, %s1081_s30  }
  0x30   : > { %s1404_s14 = sshll.u32 %s1077_s24, 3  ;;  %p1225_p7 = pnand %p738_p0, %p268_p1 }
  0x31   : > { %s257_s7 = scalar_lea.hbm %s1379_s1, %s1404_s14  ;;  %s1406_s18 = sshll.u32 %s1184_s11, 5 }
  0x32   : > { %s258_s16 = sshll.u32 %s257_s7, 4  ;;  %s253_s0 = scalar_lea.vmem [#allocation7], %s1406_s18  ;;  %s259_s16 = int_to_ptr.hbm [resolvable:$true] %s258_s16 }
  0x33   : > { %s260_s23 = sshll.u32 %s253_s0, 4  ;;  %s250_s27 = scalar_lea.sflag [#allocation8], %s1184_s11  ;;  %s261_s23 = int_to_ptr.vmem [resolvable:$true] %s260_s23 }
  0x34   : > { %s867_s10 = sshra.s32 %s259_s16, 4  ;;  %s874_s14 = scalar_lea.hbm %s1379_s1, 64  ;;  %s868_s10 = int_to_ptr.hbm [resolvable:$true] %s867_s10 }
  0x35   : > { %s869_s17 = scalar_lea.hbm %s868_s10, 32  ;;  %p875_p0 = scmp.lt.s32.totalorder %s868_s10, %s1379_s1 }
  0x36   : > { %p870_p9 = scmp.ne.s32.totalorder %s868_s10, %s869_s17  ;;  %p876_p5 = scmp.lt.s32.totalorder %s874_s14, %s869_s17 }
  0x38   : > { %p872_p3 = pnand %p870_p9, %p841_p2  ;;  %p877_p10 = por %p876_p5, %p875_p0 }
  0x3a   : > { %p873_p8 = pneg %p872_p3 }
  0x3c   : > { %p878_p1 = pnand %p877_p10, %p873_p8 }
  0x3e   : > { %881 = shalt.err (!%p878_p1)
}
  0x3f   : > { %776 = dma.hbm_to_vmem [thread:$0]  (!%p1197_p13), %s259_s16, 512, %s261_s23, %s250_s27, %s1079_s13, %s1080_s12, %s1081_s30  }
  0x40   : > { %272 = sbr.rel (%p1225_p7) target bundleno = 336 (0x150), region = 28  ;;  %s1247_s0 = sand.u32 (!%p1225_p7), 1, %s1069_s22  }
  0x41   : > { %s739_s11 = sshll.u32 (!%p1225_p7), %s1247_s0, 5  ;;  %s275_s7 = scalar_lea.sflag (!%p1225_p7), [#allocation4], %s1247_s0 }
  0x42   : > { %s278_s10 = scalar_lea.vmem (!%p1225_p7), [#allocation3], %s739_s11 }
  0x45   : > { %1040 = dma.done.wait (%p1164_p6), %s275_s7, 512  }
  0x46   : > { %1042 = vsyncadd (%p1164_p6), %s275_s7, 4294966784  ;;  %s285_s23 = scalar_lea.sflag [#allocation8], %s1247_s0  ;;  %s288_s27 = scalar_lea.vmem [#allocation7], %s739_s11 }
  0x47   : > { %1044 = dma.done.wait (%p1164_p6), %s285_s23, 512  }
  0x48   : > { %1046 = vsyncadd (%p1164_p6), %s285_s23, 4294966784  ;;  %v334_v0 = vld [vmem:[%s278_s10] sm:$0xff]  ;;  %v335_v1 = vld [vmem:[%s278_s10 + $0x8] sm:$0xff]  ;;  %vm444_vm6 = vcmask 1040384   ;;  %s1082_s30 = smov 0.0   ;;  %s506_s13 = scalar_lea.hbm %s1381_s3, %s1140_s25 }
  0x49   : > { %v336_v2 = vld [vmem:[%s278_s10 + $0x10] sm:$0xff]  ;;  %v338_v3 = vld [vmem:[%s288_s27] sm:$0xff]  ;;  %v339_v4 = vld [vmem:[%s288_s27 + $0x8] sm:$0xff]  ;;  %v342_v5 = vadd.f32 %v335_v1, %v334_v0  ;;  %755 = sst [smem:[#allocation2]] (%p54_p4), %s1082_s30  ;;  %s319_s20 = scalar_lea.vmem [#allocation10], %s1247_s0 }
  0x4a   : > { %v337_v6 = vld [vmem:[%s278_s10 + $0x18] sm:$0xff]  ;;  %v340_v7 = vld [vmem:[%s288_s27 + $0x10] sm:$0xff]  ;;  %v352_v8 = vadd.f32 %v339_v4, %v338_v3  ;;  %s476_s15 = sand.u32 1, %s1140_s25   ;;  %s508_s16 = sshll.u32 %s319_s20, 4  ;;  %s509_s16 = int_to_ptr.vmem [resolvable:$true] %s508_s16 }
  0x4b   : > { %v341_v9 = vld [vmem:[%s288_s27 + $0x18] sm:$0xff]  ;;  %v343_v10 = vadd.f32 %v342_v5, %v336_v2  ;;  %s510_s18 = sshll.u32 %s506_s13, 4  ;;  %s313_s17 = scalar_lea.vmem [#allocation9], %s1247_s0  ;;  %s511_s18 = int_to_ptr.hbm [resolvable:$true] %s510_s18 }
  0x4c   : > { %v353_v11 = vadd.f32 %v352_v8, %v340_v7  ;;  %s1285_s19 = scalar_lea.sflag [#allocation11], %s476_s15  ;;  %s911_s28 = sshra.s32 %s511_s18, 4  ;;  %s912_s28 = int_to_ptr.hbm [resolvable:$true] %s911_s28 }
  0x4d   : > { %v344_v12 = vadd.f32 %v343_v10, %v337_v6  ;;  %s913_s14 = scalar_lea.hbm %s912_s28, 1  ;;  %s917_s11 = scalar_lea.hbm %s1381_s3, 2 }
  0x4e   : > { %v354_v13 = vadd.f32 %v353_v11, %v341_v9  ;;  %p914_p4 = scmp.ne.s32.totalorder %s912_s28, %s913_s14  ;;  %p918_p2 = scmp.lt.s32.totalorder %s912_s28, %s1381_s3 }
  0x4f   : > { %v345_v14 = vrot.slane %v344_v12, 4  ;;  %p919_p7 = scmp.lt.s32.totalorder %s917_s11, %s913_s14 }
  0x50   : > { %v355_v15 = vrot.slane %v354_v13, 4  ;;  %p915_p6 = pnand %p914_p4, %p1175_p11 }
  0x51   : > { %v346_v16 = vadd.f32 %v345_v14, %v344_v12  ;;  %p920_p9 = por %p919_p7, %p918_p2 }
  0x52   : > { %v356_v17 = vadd.f32 %v355_v15, %v354_v13  ;;  %p916_p13 = pneg %p915_p6 }
  0x53   : > { %v347_v18 = vrot.slane %v346_v16, 2 }
  0x54   : > { %v357_v19 = vrot.slane %v356_v17, 2  ;;  %p921_p3 = pnand %p920_p9, %p916_p13 }
  0x55   : > { %v348_v20 = vadd.f32 %v347_v18, %v346_v16 }
  0x56   : > { %v358_v21 = vadd.f32 %v357_v19, %v356_v17 }
  0x57   : > { %v349_v22 = vrot.slane %v348_v20, 1 }
  0x58   : > { %v359_v23 = vrot.slane %v358_v21, 1 }
  0x59   : > { %v350_v24 = vadd.f32 %v349_v22, %v348_v20 }
  0x5a   : > { %v360_v25 = vadd.f32 %v359_v23, %v358_v21 }
  0x5b   : > { %v1260_v26 = vmul.f32 0.03125, %v350_v24 }
  0x5c   : > { %v1262_v27 = vmul.f32 0.03125, %v360_v25 }
  0x5d   : > { %v362_v28 = vsub.f32 %v334_v0, %v1260_v26  ;;  %v363_v29 = vsub.f32 %v335_v1, %v1260_v26  ;;  %v364_v30 = vsub.f32 %v336_v2, %v1260_v26  ;;  %v365_v31 = vsub.f32 %v337_v6, %v1260_v26  ;;  %420 = vst [vmem:[%s313_s17] sm:$0x1] %v1260_v26 }
  0x5e   : > { %v366_v32 = vsub.f32 %v338_v3, %v1262_v27  ;;  %v367_v33 = vsub.f32 %v339_v4, %v1262_v27  ;;  %v368_v34 = vsub.f32 %v340_v7, %v1262_v27  ;;  %v369_v35 = vsub.f32 %v341_v9, %v1262_v27 }
  0x5f   : > { %v370_v36 = vmul.f32 %v362_v28, %v362_v28  ;;  %v371_v37 = vmul.f32 %v363_v29, %v363_v29  ;;  %v372_v38 = vmul.f32 %v364_v30, %v364_v30  ;;  %v373_v42 = vmul.f32 %v365_v31, %v365_v31 }
  0x60   : > { %v384_v39 = vmul.f32 %v366_v32, %v366_v32  ;;  %v385_v40 = vmul.f32 %v367_v33, %v367_v33  ;;  %v386_v41 = vmul.f32 %v368_v34, %v368_v34  ;;  %v387_v44 = vmul.f32 %v369_v35, %v369_v35 }
  0x61   : > { %v374_v43 = vadd.f32 %v371_v37, %v370_v36  ;;  %v424_v48 = vmul.f32 %v366_v32, %v362_v28  ;;  %v425_v49 = vmul.f32 %v367_v33, %v363_v29  ;;  %v426_v54 = vmul.f32 %v368_v34, %v364_v30 }
  0x62   : > { %v388_v45 = vadd.f32 %v385_v40, %v384_v39  ;;  %v427_v60 = vmul.f32 %v369_v35, %v365_v31 }
  0x63   : > { %v375_v46 = vadd.f32 %v374_v43, %v372_v38  ;;  %v428_v55 = vadd.f32 %v425_v49, %v424_v48 }
  0x64   : > { %v389_v47 = vadd.f32 %v388_v45, %v386_v41 }
  0x65   : > { %v376_v50 = vadd.f32 %v375_v46, %v373_v42  ;;  %v429_v61 = vadd.f32 %v428_v55, %v426_v54 }
  0x66   : > { %v390_v51 = vadd.f32 %v389_v47, %v387_v44 }
  0x67   : > { %v377_v52 = vrot.slane %v376_v50, 4  ;;  %v430_v2 = vadd.f32 %v429_v61, %v427_v60 }
  0x68   : > { %v391_v53 = vrot.slane %v390_v51, 4 }
  0x69   : > { %v378_v56 = vadd.f32 %v377_v52, %v376_v50  ;;  %v431_v7 = vrot.slane %v430_v2, 4 }
  0x6a   : > { %v392_v57 = vadd.f32 %v391_v53, %v390_v51 }
  0x6b   : > { %v379_v58 = vrot.slane %v378_v56, 2  ;;  %v432_v8 = vadd.f32 %v431_v7, %v430_v2 }
  0x6c   : > { %v393_v59 = vrot.slane %v392_v57, 2 }
  0x6d   : > { %v380_v62 = vadd.f32 %v379_v58, %v378_v56  ;;  %v433_v12 = vrot.slane %v432_v8, 2 }
  0x6e   : > { %v394_v63 = vadd.f32 %v393_v59, %v392_v57 }
  0x6f   : > { %v381_v0 = vrot.slane %v380_v62, 1  ;;  %v434_v17 = vadd.f32 %v433_v12, %v432_v8 }
  0x70   : > { %v395_v1 = vrot.slane %v394_v63, 1 }
  0x71   : > { %v382_v3 = vadd.f32 %v381_v0, %v380_v62  ;;  %v435_v22 = vrot.slane %v434_v17, 1 }
  0x72   : > { %v396_v4 = vadd.f32 %v395_v1, %v394_v63 }
  0x73   : > { %v383_v5 = vmul.f32 0.032258064, %v382_v3  ;;  %v436_v30 = vadd.f32 %v435_v22, %v434_v17 }
  0x74   : > { %v397_v6 = vmul.f32 0.032258064, %v396_v4 }
  0x75   : > { %833 = vrsqrt.f32 %v383_v5  ;;  %vm404_vm0 = vweird.f32 %v383_v5 }
  0x76   : > { %835 = vrsqrt.f32 %v397_v6  ;;  %vm415_vm2 = vweird.f32 %v397_v6 }
  0x7b   : > { %v834_v9 = vpop.eup %833 }
  0x7c   : > { %v836_v10 = vpop.eup %835  ;;  %v399_v11 = vmul.f32 %v834_v9, %v383_v5  ;;  %vm405_vm1 = vweird.f32 %v834_v9 }
  0x7d   : > { %v410_v13 = vmul.f32 %v836_v10, %v397_v6  ;;  %vm416_vm3 = vweird.f32 %v836_v10  ;;  %vm406_vm4 = vmor %vm404_vm0, %vm405_vm1 }
  0x7e   : > { %v400_v14 = vmul.f32 %v834_v9, %v399_v11  ;;  %vm417_vm5 = vmor %vm415_vm2, %vm416_vm3 }
  0x7f   : > { %v411_v15 = vmul.f32 %v836_v10, %v410_v13 }
  0x80   : > { %v401_v16 = vmul.f32 0.5, %v400_v14 }
  0x81   : > { %v412_v18 = vmul.f32 0.5, %v411_v15 }
  0x82   : > { %v402_v19 = vsub.f32 1.5, %v401_v16 }
  0x83   : > { %v413_v20 = vsub.f32 1.5, %v412_v18 }
  0x84   : > { %v403_v21 = vmul.f32 %v834_v9, %v402_v19 }
  0x85   : > { %v414_v23 = vmul.f32 %v836_v10, %v413_v20 }
  0x86   : > { %v407_v24 = vsel %vm406_vm4, %v834_v9, %v403_v21 }
  0x87   : > { %v408_v25 = vmul.f32 0.17677669, %v407_v24  ;;  %v418_v28 = vsel %vm417_vm5, %v836_v10, %v414_v23 }
  0x88   : > { %v1272_v29 = vmul.f32 0.17677669, %v418_v28 }
  0x89   : > { %421 = vst [vmem:[%s319_s20] sm:$0x1] %v408_v25 }
  0x8a   : > { %v437_v31 = vmul.f32 %v1272_v29, %v408_v25 }
  0x8c   : > { %v438_v32 = vmul.f32 %v437_v31, %v436_v30 }
  0x8e   : > { %v741_v33 = vadd.f32 -1.0, %v438_v32  ;;  %v441_v34 = vmul.f32 0.005, %v438_v32 }
  0x90   : > { %v440_v35 = vmul.f32 %v741_v33, %v741_v33  ;;  %v442_v36 = vmul.f32 %v441_v34, %v438_v32 }
  0x92   : > { %v443_v37 = vsub.f32 %v440_v35, %v442_v36 }
  0x94   : > { %v445_v38 = vsel %vm444_vm6, %v443_v37, 0.0 }
  0x95   : > { %446 = vadd.xlane.f32.xlu0 %v445_v38 }
  0x96   : > { %924 = shalt.err (!%p921_p3)
}
  0x97   : > { %759 = dma.vmem_to_hbm [thread:$0]  (%p1175_p11), %s509_s16, 16, %s511_s18, %s1285_s19  }
  0x98   : > { %s493_s30 = scalar_lea.hbm %s1380_s2, %s1140_s25  ;;  %s495_s8 = sshll.u32 %s313_s17, 4  ;;  %s496_s8 = int_to_ptr.vmem [resolvable:$true] %s495_s8 }
  0x99   : > { %s497_s12 = sshll.u32 %s493_s30, 4  ;;  %s473_s13 = scalar_lea.sflag [#allocation5], %s1247_s0  ;;  %s498_s12 = int_to_ptr.hbm [resolvable:$true] %s497_s12 }
  0x9a   : > { %s939_s20 = sshra.s32 %s498_s12, 4  ;;  %s945_s16 = scalar_lea.hbm %s1380_s2, 2  ;;  %s940_s20 = int_to_ptr.hbm [resolvable:$true] %s939_s20 }
  0x9b   : > { %s941_s15 = scalar_lea.hbm %s940_s20, 1  ;;  %p946_p10 = scmp.lt.s32.totalorder %s940_s20, %s1380_s2 }
  0x9c   : > { %p942_p8 = scmp.ne.s32.totalorder %s940_s20, %s941_s15  ;;  %p947_p1 = scmp.lt.s32.totalorder %s945_s16, %s941_s15 }
  0x9e   : > { %p943_p0 = pnand %p942_p8, %p1175_p11  ;;  %p948_p4 = por %p947_p1, %p946_p10 }
  0xa0   : > { %p944_p5 = pneg %p943_p0 }
  0xa2   : > { %p949_p6 = pnand %p948_p4, %p944_p5 }
  0xa4   : > { %952 = shalt.err (!%p949_p6)
}
  0xa5   : > { %758 = dma.vmem_to_hbm [thread:$0]  (%p1175_p11), %s496_s8, 16, %s498_s12, %s473_s13  }
  0xa6   : > { %s325_s17 = scalar_lea.vmem [#allocation12], %s1247_s0  ;;  %s519_s7 = scalar_lea.hbm %s1382_s4, %s1140_s25 }
  0xa7   : > { %422 = vst [vmem:[%s325_s17] sm:$0x1] %v1262_v27  ;;  %s521_s10 = sshll.u32 %s325_s17, 4  ;;  %s523_s23 = sshll.u32 %s519_s7, 4  ;;  %s522_s10 = int_to_ptr.vmem [resolvable:$true] %s521_s10  ;;  %s524_s23 = int_to_ptr.hbm [resolvable:$true] %s523_s23 }
  0xa8   : > { %s967_s27 = sshra.s32 %s524_s23, 4  ;;  %s973_s12 = scalar_lea.hbm %s1382_s4, 2  ;;  %s968_s27 = int_to_ptr.hbm [resolvable:$true] %s967_s27 }
  0xa9   : > { %s969_s30 = scalar_lea.hbm %s968_s27, 1  ;;  %p974_p9 = scmp.lt.s32.totalorder %s968_s27, %s1382_s4 }
  0xaa   : > { %p970_p13 = scmp.ne.s32.totalorder %s968_s27, %s969_s30  ;;  %p975_p3 = scmp.lt.s32.totalorder %s973_s12, %s969_s30 }
  0xac   : > { %p971_p2 = pnand %p970_p13, %p1175_p11  ;;  %p976_p8 = por %p975_p3, %p974_p9 }
  0xae   : > { %p972_p7 = pneg %p971_p2 }
  0xb0   : > { %p977_p0 = pnand %p976_p8, %p972_p7 }
  0xb2   : > { %980 = shalt.err (!%p977_p0)
}
  0xb3   : > { %760 = dma.vmem_to_hbm [thread:$0]  (%p1175_p11), %s522_s10, 16, %s524_s23, %s1285_s19  }
  0xb4   : > { %s331_s28 = scalar_lea.vmem [#allocation13], %s1247_s0  ;;  %s532_s18 = scalar_lea.hbm %s1383_s5, %s1140_s25 }
  0xb5   : > { %423 = vst [vmem:[%s331_s28] sm:$0x1] %v1272_v29  ;;  %s534_s29 = sshll.u32 %s331_s28, 4  ;;  %s536_s17 = sshll.u32 %s532_s18, 4  ;;  %s535_s29 = int_to_ptr.vmem [resolvable:$true] %s534_s29  ;;  %s537_s17 = int_to_ptr.hbm [resolvable:$true] %s536_s17 }
  0xb6   : > { %s485_s26 = scalar_lea.sflag [#allocation14], %s1247_s0  ;;  %s995_s11 = sshra.s32 %s537_s17, 4  ;;  %s996_s11 = int_to_ptr.hbm [resolvable:$true] %s995_s11 }
  0xb7   : > { %s997_s7 = scalar_lea.hbm %s996_s11, 1  ;;  %s1001_s23 = scalar_lea.hbm %s1383_s5, 2 }
  0xb8   : > { %p998_p5 = scmp.ne.s32.totalorder %s996_s11, %s997_s7  ;;  %p1002_p4 = scmp.lt.s32.totalorder %s996_s11, %s1383_s5 }
  0xb9   : > { %p1003_p6 = scmp.lt.s32.totalorder %s1001_s23, %s997_s7 }
  0xba   : > { %p999_p10 = pnand %p998_p5, %p1175_p11 }
  0xbb   : > { %p1004_p13 = por %p1003_p6, %p1002_p4 }
  0xbc   : > { %p1000_p1 = pneg %p999_p10 }
  0xbe   : > { %p1005_p2 = pnand %p1004_p13, %p1000_p1 }
  0xc0   : > { %1008 = shalt.err (!%p1005_p2)
}
  0xc1   : > { %761 = dma.vmem_to_hbm [thread:$0]  (%p1175_p11), %s535_s29, 16, %s537_s17, %s485_s26  }
  0xc2   : > { %s461_s0 = sld [smem:[#allocation2]]  ;;  %s546_s12 = sshll.u32 %s1384_s6, 4  ;;  %s547_s12 = int_to_ptr.hbm [resolvable:$true] %s546_s12 }
  0xc3   : > { %p1407_p11 = scmp.eq.s32.totalorder %s1140_s25, 1  ;;  %s1083_s9 = smov [#allocation15]  }
  0xc5   : > { %p1408_p7 = pmov %p1407_p11 }
  0xc7   : > { %p1409_p9 = pmov %p1408_p7 }
 0x108   : > { %v447_v26 = vpop.xlane.xlu0 %446 }
 0x109   : > { %v448_v27 = vrot.slane %v447_v26, 4 }
 0x10b   : > { %v449_v39 = vadd.f32 %v448_v27, %v447_v26 }
 0x10d   : > { %v450_v40 = vrot.slane %v449_v39, 2 }
 0x10f   : > { %v451_v41 = vadd.f32 %v450_v40, %v449_v39 }
 0x111   : > { %v452_v42 = vrot.slane %v451_v41, 1 }
 0x113   : > { %v453_v43 = vadd.f32 %v452_v42, %v451_v41 }
 0x115   : > { %748 = vpush %v453_v43 }
 0x146   : > { %s749_s13 = spop %748 }
 0x147   : > { %s462_s15 = sadd.f32 %s749_s13, %s461_s0 }
 0x149   : > { %464 = sst [smem:[#allocation2]] %s462_s15 }
 0x14a   : > { %757 = sst [smem:[#allocation15]] (%p1407_p11), %s462_s15 }
 0x14b   : > { %763 = dma.smem_to_hbm (%p1408_p7), %s1083_s9, 16, %s547_s12, [#allocation6]  }
 0x14c   : > { %1048 = dma.done.wait (%p1409_p9), [#allocation6], 16   ;;  %p1410_p3 = pmov %p1408_p7 }
 0x14e   : > { %1050 = vsyncadd (%p1410_p3), [#allocation6], 4294967280 }
 0x14f   : > { %555 = sfence }
 0x150 PF: > { %s564_s14 = sand.u32 1, %s1065_s21   ;;  %p1412_p8 = scmp.ge.s32.totalorder %s1077_s24, 2 }
 0x151   : > { %s565_s16 = scalar_lea.sflag [#allocation5], %s564_s14 }
 0x152   : > { %p778_p0 = pnand %p1412_p8, %p1179_p12 }
 0x154   : > { %p779_p5 = pneg %p778_p0 }
 0x156   : > { %1052 = dma.done.wait (%p779_p5), %s565_s16, 16  }
 0x157   : > { %1054 = vsyncadd (%p779_p5), %s565_s16, 4294967280  ;;  %s1413_s18 = sadd.s32 4294967294, %s1077_s24  }
 0x158   : > { %s573_s29 = sand.u32 1, %s1413_s18  }
 0x159   : > { %s574_s17 = scalar_lea.sflag [#allocation11], %s573_s29 }
 0x15a   : > { %1056 = dma.done.wait (%p779_p5), %s574_s17, 32  }
 0x15b   : > { %1058 = vsyncadd (%p779_p5), %s574_s17, 4294967264  ;;  %s592_s25 = scalar_lea.sflag [#allocation14], %s564_s14 }
 0x15c   : > { %1060 = dma.done.wait (%p779_p5), %s592_s25, 16  }
 0x15d   : > { %1062 = vsyncadd (%p779_p5), %s592_s25, 4294967280  ;;  %s1414_s24 = sld [smem:[#allocation23_spill]]  ;;  %s1417_s21 = smov %s1069_s22 }
 0x15e   : > { %s1415_s26 = sld [smem:[#allocation22_spill]] }
 0x15f   : > { %s1416_s23 = sld [smem:[#allocation24_spill]] }
 0x163   : > { %p30_p10 = scmp.ge.s32.totalorder %s1414_s24, 4  }
 0x164   : > { %s1418_s22 = smov %s1415_s26 }
 0x165   :  { %32 = sbr.rel (!%p30_p10) target bundleno = 14 (0xe), region = 155 }
 0x16a   :  { %597 = vsyncpa [#allocation4], 1 }
 0x16b   :  { %599 = vsyncpa [#allocation4 + $0x1], 1 }
 0x16c   :  { %600 = vsyncpa [#allocation8], 1 }
 0x16d   :  { %602 = vsyncpa [#allocation8 + $0x1], 1 }
 0x16e   :  { %603 = vsyncpa [#allocation5], 1 }
 0x16f   :  { %605 = vsyncpa [#allocation5 + $0x1], 1 }
 0x170   :  { %606 = vsyncpa [#allocation11], 1 }
 0x171   :  { %608 = vsyncpa [#allocation11 + $0x1], 1 }
 0x172   :  { %609 = vsyncpa [#allocation14], 1 }
 0x173   :  { %611 = vsyncpa [#allocation14 + $0x1], 1 }
 0x174   :  { %612 = vsyncpa [#allocation6], 1 }
 0x175   :  { %614 = vsyncpa [#allocation6 + $0x1], 1 }

</bundles_post_ra>
